<compile_context>
chip_gen: v7x
topology: tpu7x:2x2x1
jax: 0.10.0
libtpu: 0.0.40
codegen_flags: <defaults>
</compile_context>

<pallas_src>
import functools

import jax
import jax.numpy as jnp
from jax.experimental import pallas as pl
from jax.experimental.pallas import tpu as pltpu


def _conv1d_block_kernel(x_ref, w_ref, b_ref, o_ref, *, kernel_size, pad_left,
                         negative_slope):
    """Fused Conv1d('same', stride=1) + LeakyReLU for one batch block.

    x_ref : (B_blk, C_in, L)      input block (NCL layout, L on lanes)
    w_ref : (C_out, C_in * K)     conv weight, element [co, ci*K + k]
    b_ref : (C_out, 1)            conv bias
    o_ref : (B_blk, C_out, L)     output block (NCL layout, lane-dense)
    """
    b_blk, c_in, l = x_ref.shape
    c_out = o_ref.shape[1]
    k_taps = kernel_size

    # Single read of the input block and of the weights (hoisted out of the
    # tap loop -- JAX does not CSE these for us).
    x = x_ref[...].astype(jnp.float32)             # (B, C_in, L)
    w_all = w_ref[...].astype(jnp.float32)         # (C_out, C_in*K)
    bias = b_ref[...].astype(jnp.float32)[None]    # (1, C_out, 1)

    acc = jnp.zeros((b_blk, c_out, l), jnp.float32)
    for k in range(k_taps):
        d = k - pad_left  # input offset contributed by this tap
        # 'same' zero padding as an in-register lane shift with zero fill:
        # x_shift[b, ci, l] = x[b, ci, l + d] (0 when l + d is out of range).
        if d == 0:
            x_shift = x
        elif d > 0:
            x_shift = jnp.concatenate(
                [x[:, :, d:], jnp.zeros((b_blk, c_in, d), jnp.float32)],
                axis=-1)
        else:
            x_shift = jnp.concatenate(
                [jnp.zeros((b_blk, c_in, -d), jnp.float32), x[:, :, :l + d]],
                axis=-1)
        # VPU broadcast-FMA over the tap's input channels:
        #   (1, C_out, 1) weight column x (B, 1, L) shifted row -> (B, C_out, L)
        for ci in range(c_in):
            idx = ci * k_taps + k
            w_col = w_all[:, idx:idx + 1][None]          # (1, C_out, 1)
            acc = acc + w_col * x_shift[:, ci:ci + 1, :]

    acc = acc + bias

    # LeakyReLU in f32 on the VPU; cast only at the final lane-dense store.
    y = jnp.where(acc >= 0, acc, negative_slope * acc)

    # TODO(synk): Dropout(p=0.2) is eval-mode identity here; a training-mode
    # variant would build the keep-mask with pltpu.prng_seed/prng_random_bits
    # keyed on pl.program_id(0) so masks differ across batch blocks.
    o_ref[...] = y.astype(o_ref.dtype)


def conv1d_block(x_ncl, weight, bias, *, negative_slope=0.01):
    """Conv1dBlock forward: Conv1d(padding='same', stride=1) + LeakyReLU.

    x_ncl : (N, C_in, L)       PyTorch NCL layout (kept as-is, no transpose)
    weight: (C_out, C_in, K)   PyTorch Conv1d weight layout
    bias  : (C_out,)
    returns (N, C_out, L)      PyTorch NCL layout
    """
    n, c_in, l = x_ncl.shape
    c_out, _, k = weight.shape
    # PyTorch 'same' (stride=1): (K-1)//2 zeros on the left, rest on the right.
    pad_left = (k - 1) // 2

    w2d = weight.reshape(c_out, c_in * k)   # [co, ci*K + kk] == weight[co, ci, kk]
    b2d = bias.reshape(c_out, 1)

    # ---- Batch-blocked grid sizing -----------------------------------------
    # Target ~1 MiB of (logical) output per grid step to amortize the ~0.35 us
    # per-step fixed cost; cap by a VMEM budget (double-buffered in/out tiles
    # plus f32 in-kernel intermediates, sublane/lane padded) that fits v5e's
    # 16 MiB scoped default and v7x's smaller VMEM; keep >=~4 grid steps when
    # the batch allows it (pipelining depth + v7x 2-TensorCore split).
    lpad = pl.cdiv(l, 128) * 128
    per_sample_bytes = 4 * lpad * (pl.cdiv(c_in, 8) * 8 + pl.cdiv(c_out, 8) * 8)
    b_blk = max(1, (1 << 20) // max(1, 4 * l * c_out))
    b_blk = min(b_blk, max(1, (10 << 20) // max(1, 4 * per_sample_bytes)))
    b_blk = min(b_blk, max(1, pl.cdiv(n, 4)))
    grid_n = pl.cdiv(n, b_blk)
    n_pad = grid_n * b_blk

    x_in = x_ncl
    if n_pad != n:  # zero-pad the batch so blocks tile it exactly
        x_in = jnp.pad(x_ncl, ((0, n_pad - n), (0, 0), (0, 0)))

    kernel = functools.partial(
        _conv1d_block_kernel,
        kernel_size=k, pad_left=pad_left, negative_slope=negative_slope)

    cost = pl.CostEstimate(
        flops=2 * n_pad * c_out * c_in * k * l,
        transcendentals=0,
        bytes_accessed=4 * n_pad * l * (c_in + c_out)
        + 4 * (c_out * c_in * k + c_out),
    )

    out = pl.pallas_call(
        kernel,
        out_shape=jax.ShapeDtypeStruct((n_pad, c_out, l), x_ncl.dtype),
        grid=(grid_n,),
        in_specs=[
            pl.BlockSpec((b_blk, c_in, l), lambda b: (b, 0, 0)),    # x block
            pl.BlockSpec((c_out, c_in * k), lambda b: (0, 0)),      # weights resident
            pl.BlockSpec((c_out, 1), lambda b: (0, 0)),             # bias resident
        ],
        out_specs=pl.BlockSpec((b_blk, c_out, l), lambda b: (b, 0, 0)),
        compiler_params=pltpu.CompilerParams(
            # Batch-block axis is embarrassingly parallel -> both v7x TCs.
            dimension_semantics=("parallel",)),
        cost_estimate=cost,
    )(x_in, w2d, b2d)

    if n_pad != n:
        out = out[:n]
    return out


def _reference(x_ncl, weight, bias, negative_slope=0.01):
    """Pure-JAX reference (lax.conv_general_dilated) for correctness check."""
    y = jax.lax.conv_general_dilated(
        x_ncl, weight,
        window_strides=(1,),
        padding="SAME",
        dimension_numbers=("NCH", "OIH", "NCH"),
    ) + bias[None, :, None]
    return jnp.where(y >= 0, y, negative_slope * y)


if __name__ == "__main__":
    # Module hyperparameters (consistent with Conv1dBlock.__init__).
    in_channels, out_channels = 4, 8
    kernel_size, stride, padding = 3, 1, "same"

    batch, length = 2, 16

    key = jax.random.PRNGKey(0)
    kx, kw, kb = jax.random.split(key, 3)

    x = jax.random.normal(kx, (batch, in_channels, length), dtype=jnp.float32)
    # Deterministic synthetic parameters (PyTorch-style fan-in scaling).
    fan_in = in_channels * kernel_size
    bound = 1.0 / jnp.sqrt(fan_in)
    weight = jax.random.uniform(
        kw, (out_channels, in_channels, kernel_size),
        minval=-bound, maxval=bound, dtype=jnp.float32)
    bias = jax.random.uniform(
        kb, (out_channels,), minval=-bound, maxval=bound, dtype=jnp.float32)

    out = conv1d_block(x, weight, bias)
    out = jax.block_until_ready(out)

    ref = _reference(x, weight, bias)
    assert out.shape == (batch, out_channels, length), out.shape
    assert jnp.allclose(out, ref, atol=1e-5, rtol=1e-5), (
        float(jnp.max(jnp.abs(out - ref))))

    print("KERNEL_OK")
</pallas_src>

<mosaic_0001>
module attributes {stable_mosaic.version = 11 : i64} {
  func.func @_conv1d_block_kernel(%arg0: i32, %arg1: memref<1x4x16xf32, #tpu.memory_space<vmem>>, %arg2: memref<8x12xf32, #tpu.memory_space<vmem>>, %arg3: memref<8x1xf32, #tpu.memory_space<vmem>>, %arg4: memref<1x8x16xf32, #tpu.memory_space<vmem>>) attributes {dimension_semantics = [#tpu.dimension_semantics<parallel>], iteration_bounds = array<i64: 2>, scalar_prefetch = 0 : i64, scratch_operands = 0 : i64, tpu.core_type = #tpu.core_type<tc>, window_params = [{transform_indices = @transform_0, window_bounds = array<i64: 1, 4, 16>}, {pipeline_mode = #tpu.pipeline_mode<synchronous>, transform_indices = @transform_1, window_bounds = array<i64: 8, 12>}, {pipeline_mode = #tpu.pipeline_mode<synchronous>, transform_indices = @transform_2, window_bounds = array<i64: 8, 1>}, {transform_indices = @transform_3, window_bounds = array<i64: 1, 8, 16>}]} {
    %c0 = arith.constant 0 : index
    %c0_0 = arith.constant 0 : index
    %c0_1 = arith.constant 0 : index
    %0 = vector.load %arg1[%c0, %c0_0, %c0_1] : memref<1x4x16xf32, #tpu.memory_space<vmem>>, vector<1x4x16xf32>
    %c0_2 = arith.constant 0 : index
    %c0_3 = arith.constant 0 : index
    %1 = vector.load %arg2[%c0_2, %c0_3] : memref<8x12xf32, #tpu.memory_space<vmem>>, vector<8x12xf32>
    %c0_4 = arith.constant 0 : index
    %c0_5 = arith.constant 0 : index
    %2 = vector.load %arg3[%c0_4, %c0_5] : memref<8x1xf32, #tpu.memory_space<vmem>>, vector<8x1xf32>
    %3 = vector.shape_cast %2 : vector<8x1xf32> to vector<1x8x1xf32>
    %cst = arith.constant 0.000000e+00 : f32
    %4 = vector.broadcast %cst : f32 to vector<1x8x16xf32>
    %cst_6 = arith.constant 0.000000e+00 : f32
    %5 = vector.broadcast %cst_6 : f32 to vector<1x4x1xf32>
    %6 = vector.extract_strided_slice %0 {offsets = [0, 0, 0], sizes = [1, 4, 15], strides = [1, 1, 1]} : vector<1x4x16xf32> to vector<1x4x15xf32>
    %7 = tpu.concatenate %5, %6 in 2 : vector<1x4x1xf32>, vector<1x4x15xf32> -> vector<1x4x16xf32>
    %8 = vector.extract_strided_slice %1 {offsets = [0, 0], sizes = [8, 1], strides = [1, 1]} : vector<8x12xf32> to vector<8x1xf32>
    %9 = vector.shape_cast %8 : vector<8x1xf32> to vector<1x8x1xf32>
    %10 = vector.extract_strided_slice %7 {offsets = [0, 0, 0], sizes = [1, 1, 16], strides = [1, 1, 1]} : vector<1x4x16xf32> to vector<1x1x16xf32>
    %11 = vector.broadcast %9 : vector<1x8x1xf32> to vector<1x8x16xf32>
    %12 = vector.broadcast %10 : vector<1x1x16xf32> to vector<1x8x16xf32>
    %13 = arith.mulf %11, %12 : vector<1x8x16xf32>
    %14 = arith.addf %4, %13 : vector<1x8x16xf32>
    %15 = vector.extract_strided_slice %1 {offsets = [0, 3], sizes = [8, 1], strides = [1, 1]} : vector<8x12xf32> to vector<8x1xf32>
    %16 = vector.shape_cast %15 : vector<8x1xf32> to vector<1x8x1xf32>
    %17 = vector.extract_strided_slice %7 {offsets = [0, 1, 0], sizes = [1, 1, 16], strides = [1, 1, 1]} : vector<1x4x16xf32> to vector<1x1x16xf32>
    %18 = vector.broadcast %16 : vector<1x8x1xf32> to vector<1x8x16xf32>
    %19 = vector.broadcast %17 : vector<1x1x16xf32> to vector<1x8x16xf32>
    %20 = arith.mulf %18, %19 : vector<1x8x16xf32>
    %21 = arith.addf %14, %20 : vector<1x8x16xf32>
    %22 = vector.extract_strided_slice %1 {offsets = [0, 6], sizes = [8, 1], strides = [1, 1]} : vector<8x12xf32> to vector<8x1xf32>
    %23 = vector.shape_cast %22 : vector<8x1xf32> to vector<1x8x1xf32>
    %24 = vector.extract_strided_slice %7 {offsets = [0, 2, 0], sizes = [1, 1, 16], strides = [1, 1, 1]} : vector<1x4x16xf32> to vector<1x1x16xf32>
    %25 = vector.broadcast %23 : vector<1x8x1xf32> to vector<1x8x16xf32>
    %26 = vector.broadcast %24 : vector<1x1x16xf32> to vector<1x8x16xf32>
    %27 = arith.mulf %25, %26 : vector<1x8x16xf32>
    %28 = arith.addf %21, %27 : vector<1x8x16xf32>
    %29 = vector.extract_strided_slice %1 {offsets = [0, 9], sizes = [8, 1], strides = [1, 1]} : vector<8x12xf32> to vector<8x1xf32>
    %30 = vector.shape_cast %29 : vector<8x1xf32> to vector<1x8x1xf32>
    %31 = vector.extract_strided_slice %7 {offsets = [0, 3, 0], sizes = [1, 1, 16], strides = [1, 1, 1]} : vector<1x4x16xf32> to vector<1x1x16xf32>
    %32 = vector.broadcast %30 : vector<1x8x1xf32> to vector<1x8x16xf32>
    %33 = vector.broadcast %31 : vector<1x1x16xf32> to vector<1x8x16xf32>
    %34 = arith.mulf %32, %33 : vector<1x8x16xf32>
    %35 = arith.addf %28, %34 : vector<1x8x16xf32>
    %36 = vector.extract_strided_slice %1 {offsets = [0, 1], sizes = [8, 1], strides = [1, 1]} : vector<8x12xf32> to vector<8x1xf32>
    %37 = vector.shape_cast %36 : vector<8x1xf32> to vector<1x8x1xf32>
    %38 = vector.extract_strided_slice %0 {offsets = [0, 0, 0], sizes = [1, 1, 16], strides = [1, 1, 1]} : vector<1x4x16xf32> to vector<1x1x16xf32>
    %39 = vector.broadcast %37 : vector<1x8x1xf32> to vector<1x8x16xf32>
    %40 = vector.broadcast %38 : vector<1x1x16xf32> to vector<1x8x16xf32>
    %41 = arith.mulf %39, %40 : vector<1x8x16xf32>
    %42 = arith.addf %35, %41 : vector<1x8x16xf32>
    %43 = vector.extract_strided_slice %1 {offsets = [0, 4], sizes = [8, 1], strides = [1, 1]} : vector<8x12xf32> to vector<8x1xf32>
    %44 = vector.shape_cast %43 : vector<8x1xf32> to vector<1x8x1xf32>
    %45 = vector.extract_strided_slice %0 {offsets = [0, 1, 0], sizes = [1, 1, 16], strides = [1, 1, 1]} : vector<1x4x16xf32> to vector<1x1x16xf32>
    %46 = vector.broadcast %44 : vector<1x8x1xf32> to vector<1x8x16xf32>
    %47 = vector.broadcast %45 : vector<1x1x16xf32> to vector<1x8x16xf32>
    %48 = arith.mulf %46, %47 : vector<1x8x16xf32>
    %49 = arith.addf %42, %48 : vector<1x8x16xf32>
    %50 = vector.extract_strided_slice %1 {offsets = [0, 7], sizes = [8, 1], strides = [1, 1]} : vector<8x12xf32> to vector<8x1xf32>
    %51 = vector.shape_cast %50 : vector<8x1xf32> to vector<1x8x1xf32>
    %52 = vector.extract_strided_slice %0 {offsets = [0, 2, 0], sizes = [1, 1, 16], strides = [1, 1, 1]} : vector<1x4x16xf32> to vector<1x1x16xf32>
    %53 = vector.broadcast %51 : vector<1x8x1xf32> to vector<1x8x16xf32>
    %54 = vector.broadcast %52 : vector<1x1x16xf32> to vector<1x8x16xf32>
    %55 = arith.mulf %53, %54 : vector<1x8x16xf32>
    %56 = arith.addf %49, %55 : vector<1x8x16xf32>
    %57 = vector.extract_strided_slice %1 {offsets = [0, 10], sizes = [8, 1], strides = [1, 1]} : vector<8x12xf32> to vector<8x1xf32>
    %58 = vector.shape_cast %57 : vector<8x1xf32> to vector<1x8x1xf32>
    %59 = vector.extract_strided_slice %0 {offsets = [0, 3, 0], sizes = [1, 1, 16], strides = [1, 1, 1]} : vector<1x4x16xf32> to vector<1x1x16xf32>
    %60 = vector.broadcast %58 : vector<1x8x1xf32> to vector<1x8x16xf32>
    %61 = vector.broadcast %59 : vector<1x1x16xf32> to vector<1x8x16xf32>
    %62 = arith.mulf %60, %61 : vector<1x8x16xf32>
    %63 = arith.addf %56, %62 : vector<1x8x16xf32>
    %64 = vector.extract_strided_slice %0 {offsets = [0, 0, 1], sizes = [1, 4, 15], strides = [1, 1, 1]} : vector<1x4x16xf32> to vector<1x4x15xf32>
    %cst_7 = arith.constant 0.000000e+00 : f32
    %65 = vector.broadcast %cst_7 : f32 to vector<1x4x1xf32>
    %66 = tpu.concatenate %64, %65 in 2 : vector<1x4x15xf32>, vector<1x4x1xf32> -> vector<1x4x16xf32>
    %67 = vector.extract_strided_slice %1 {offsets = [0, 2], sizes = [8, 1], strides = [1, 1]} : vector<8x12xf32> to vector<8x1xf32>
    %68 = vector.shape_cast %67 : vector<8x1xf32> to vector<1x8x1xf32>
    %69 = vector.extract_strided_slice %66 {offsets = [0, 0, 0], sizes = [1, 1, 16], strides = [1, 1, 1]} : vector<1x4x16xf32> to vector<1x1x16xf32>
    %70 = vector.broadcast %68 : vector<1x8x1xf32> to vector<1x8x16xf32>
    %71 = vector.broadcast %69 : vector<1x1x16xf32> to vector<1x8x16xf32>
    %72 = arith.mulf %70, %71 : vector<1x8x16xf32>
    %73 = arith.addf %63, %72 : vector<1x8x16xf32>
    %74 = vector.extract_strided_slice %1 {offsets = [0, 5], sizes = [8, 1], strides = [1, 1]} : vector<8x12xf32> to vector<8x1xf32>
    %75 = vector.shape_cast %74 : vector<8x1xf32> to vector<1x8x1xf32>
    %76 = vector.extract_strided_slice %66 {offsets = [0, 1, 0], sizes = [1, 1, 16], strides = [1, 1, 1]} : vector<1x4x16xf32> to vector<1x1x16xf32>
    %77 = vector.broadcast %75 : vector<1x8x1xf32> to vector<1x8x16xf32>
    %78 = vector.broadcast %76 : vector<1x1x16xf32> to vector<1x8x16xf32>
    %79 = arith.mulf %77, %78 : vector<1x8x16xf32>
    %80 = arith.addf %73, %79 : vector<1x8x16xf32>
    %81 = vector.extract_strided_slice %1 {offsets = [0, 8], sizes = [8, 1], strides = [1, 1]} : vector<8x12xf32> to vector<8x1xf32>
    %82 = vector.shape_cast %81 : vector<8x1xf32> to vector<1x8x1xf32>
    %83 = vector.extract_strided_slice %66 {offsets = [0, 2, 0], sizes = [1, 1, 16], strides = [1, 1, 1]} : vector<1x4x16xf32> to vector<1x1x16xf32>
    %84 = vector.broadcast %82 : vector<1x8x1xf32> to vector<1x8x16xf32>
    %85 = vector.broadcast %83 : vector<1x1x16xf32> to vector<1x8x16xf32>
    %86 = arith.mulf %84, %85 : vector<1x8x16xf32>
    %87 = arith.addf %80, %86 : vector<1x8x16xf32>
    %88 = vector.extract_strided_slice %1 {offsets = [0, 11], sizes = [8, 1], strides = [1, 1]} : vector<8x12xf32> to vector<8x1xf32>
    %89 = vector.shape_cast %88 : vector<8x1xf32> to vector<1x8x1xf32>
    %90 = vector.extract_strided_slice %66 {offsets = [0, 3, 0], sizes = [1, 1, 16], strides = [1, 1, 1]} : vector<1x4x16xf32> to vector<1x1x16xf32>
    %91 = vector.broadcast %89 : vector<1x8x1xf32> to vector<1x8x16xf32>
    %92 = vector.broadcast %90 : vector<1x1x16xf32> to vector<1x8x16xf32>
    %93 = arith.mulf %91, %92 : vector<1x8x16xf32>
    %94 = arith.addf %87, %93 : vector<1x8x16xf32>
    %95 = vector.broadcast %3 : vector<1x8x1xf32> to vector<1x8x16xf32>
    %96 = arith.addf %94, %95 : vector<1x8x16xf32>
    %cst_8 = arith.constant 0.000000e+00 : f32
    %97 = vector.broadcast %cst_8 : f32 to vector<1x8x16xf32>
    %98 = arith.cmpf oge, %96, %97 : vector<1x8x16xf32>
    %cst_9 = arith.constant 0.00999999977 : f32
    %99 = vector.broadcast %cst_9 : f32 to vector<1x8x16xf32>
    %100 = arith.mulf %99, %96 : vector<1x8x16xf32>
    %101 = arith.select %98, %96, %100 : vector<1x8x16xi1>, vector<1x8x16xf32>
    %c0_10 = arith.constant 0 : index
    %c0_11 = arith.constant 0 : index
    %c0_12 = arith.constant 0 : index
    %102 = vector.load %arg4[%c0_10, %c0_11, %c0_12] : memref<1x8x16xf32, #tpu.memory_space<vmem>>, vector<1x8x16xf32>
    tpu.vector_store %arg4[%c0_10, %c0_11, %c0_12], %101 {strides = array<i32>} : memref<1x8x16xf32, #tpu.memory_space<vmem>>, vector<1x8x16xf32>,
    return
  }
  func.func @transform_0(%arg0: i32) -> (i32, i32, i32) {
    %c0_i32 = arith.constant 0 : i32
    %c0_i32_0 = arith.constant 0 : i32
    %c0_i32_1 = arith.constant 0 : i32
    return %arg0, %c0_i32, %c0_i32_0 : i32, i32, i32
  }
  func.func @transform_1(%arg0: i32) -> (i32, i32) {
    %c0_i32 = arith.constant 0 : i32
    %c0_i32_0 = arith.constant 0 : i32
    %c0_i32_1 = arith.constant 0 : i32
    return %c0_i32, %c0_i32_0 : i32, i32
  }
  func.func @transform_2(%arg0: i32) -> (i32, i32) {
    %c0_i32 = arith.constant 0 : i32
    %c0_i32_0 = arith.constant 0 : i32
    %c0_i32_1 = arith.constant 0 : i32
    return %c0_i32, %c0_i32_0 : i32, i32
  }
  func.func @transform_3(%arg0: i32) -> (i32, i32, i32) {
    %c0_i32 = arith.constant 0 : i32
    %c0_i32_0 = arith.constant 0 : i32
    %c0_i32_1 = arith.constant 0 : i32
    return %arg0, %c0_i32, %c0_i32_0 : i32, i32, i32
  }
}

</mosaic_0001>

<bundles_post_ra>
// kernel: tpu_custom_call.1
= control target key start
LH: loop header
LB: loop body
LE: loop exit
PB: predicated region body
PF: predicated region fallthrough
CT: control target
= control target key end

     0   :  { %8 = vsyncpa [#allocation3], 0  ;;  %s778_s0 = inlined_call_operand.vmem [shape: f32[2,4,16], index: 0, kind: input, shape index: {}]   ;;  %s779_s1 = inlined_call_operand.hbm [shape: f32[8,12], index: 1, kind: input, shape index: {}]   ;;  %s780_s2 = inlined_call_operand.vmem [shape: f32[8,1], index: 2, kind: input, shape index: {}]   ;;  %s781_s3 = inlined_call_operand.hbm [shape: f32[2,8,16], index: 3, kind: output, shape index: {}]  }
   0x1   :  { %9 = vsyncpa [#allocation4], 0 }
   0x2   :  { %11 = vsyncpa [#allocation4 + $0x1], 0  ;;  %s632_s12 = smov 0   ;;  %s634_s13 = smov 0  }
   0x3   :  { %s636_s14 = smov 0   ;;  %s638_s15 = smov 0  }
   0x4 LB: > { %s653_s16 = sadd.s32 4294967295, %s594_s15   ;;  %s410_s17 = sadd.s32 4294967294, %s594_s15   ;;  %s594_s15 = sphi %s638_s15, %s797_s15   ;;  %s590_s14 = sphi %s636_s14, %s796_s14   ;;  %s586_s13 = sphi %s634_s13, %s795_s13   ;;  %s582_s12 = sphi %s632_s12, %s794_s12  }
   0x5   : > { %s657_s18 = sadd.s32 1, %s594_s15   ;;  %s92_s19 = sadd.s32 1, %s590_s14 }
   0x6   : > { %s89_s20 = ssub.s32 %s594_s15, %s657_s18  ;;  %p102_p0 = scmp.ne.s32.totalorder %s590_s14, %s586_s13 }
   0x7   : > { %p90_p1 = scmp.eq.s32.totalorder %s89_s20, 0  ;;  %p103_p2 = scmp.eq.s32.totalorder %s653_s16, 1 }
   0x8   : > { %p108_p3 = scmp.ne.s32.totalorder %s586_s13, %s582_s12  ;;  %p109_p4 = scmp.eq.s32.totalorder %s410_s17, 1 }
   0x9   : > { %s668_s21 = scalar_select %p90_p1, %s590_s14, %s92_s19  }
   0xa   : > { %p670_p5 = por %p103_p2, %p102_p0  ;;  %p674_p6 = por %p109_p4, %p108_p3 }
   0xb   : > { %p411_p7 = scmp.ge.s32.totalorder %s594_s15, 1  ;;  %p116_p8 = scmp.lt.s32.totalorder %s594_s15, 3 }
   0xc   : > { %s785_s22 = scalar_select %p670_p5, 1, 0 }
   0xd   : > { %s786_s23 = scalar_select %p674_p6, 1, 0 }
   0xe   : > { %p782_p9 = scmp.eq.s32.totalorder %s653_s16, 0  ;;  %p681_p10 = pnand %p411_p7, %p116_p8 }
   0xf   : > { %s596_s25 = smov [#allocation2]   ;;  %s500_s30 = scalar_lea.hbm %s779_s1, 128 }
  0x10   : > { %s787_s24 = scalar_select %p681_p10, 1, 0 }
  0x11   : > { %s129_s26 = sshll.u32 %s596_s25, 4  ;;  %p428_p11 = pneg %p681_p10  ;;  %s130_s26 = int_to_ptr.vmem [resolvable:$true] %s129_s26 }
  0x12   : > { %p501_p13 = scmp.ne.s32.totalorder %s779_s1, %s500_s30  ;;  %p507_p3 = scmp.lt.u32.totalorder %s500_s30, %s779_s1 }
  0x13   : > { %p689_p12 = pnand %p782_p9, %p428_p11 }
  0x15   : > { %p502_p0 = pneg %p689_p12 }
  0x17   : > { %p503_p1 = pnand %p502_p0, %p501_p13 }
  0x19   : > { %p504_p2 = pneg %p503_p1 }
  0x1b   : > { %p509_p4 = pnand %p507_p3, %p504_p2 }
  0x1d   : > { %512 = shalt.err (!%p509_p4)
}
  0x1e   : > { %s513_s8 = scalar_lea.vmem %s130_s26, 128  ;;  %p521_p9 = scmp.lt.s32.totalorder %s130_s26, %s130_s26 }
  0x1f   : > { %p514_p7 = scmp.ne.s32.totalorder %s130_s26, %s513_s8  ;;  %p522_p6 = scmp.lt.s32.totalorder %s513_s8, %s513_s8 }
  0x21   : > { %p516_p8 = pnand %p514_p7, %p502_p0  ;;  %p523_p5 = por %p522_p6, %p521_p9 }
  0x23   : > { %p517_p11 = pneg %p516_p8 }
  0x25   : > { %p524_p10 = pnand %p523_p5, %p517_p11 }
  0x27   : > { %527 = shalt.err (!%p524_p10)
}
  0x28   : > { %431 = dma.hbm_to_vmem [thread:$0]  (!%p689_p12), %s779_s1, 128, %s130_s26, [#allocation3]  }
  0x29   : > { %p789_p13 = scmp.ne.s32.totalorder %s787_s24, 0 }
  0x2a   : > { %p790_p1 = scmp.eq.s32.totalorder (!%p789_p13), %s653_s16, 0 }
  0x2b   : > { %152 = sbr.rel (%p789_p13) target bundleno = 240 (0xf0), region = 32 }
  0x32   : > { %573 = dma.done.wait (%p790_p1), [#allocation3], 128   ;;  %p791_p0 = pmov %p790_p1 }
  0x33   : > { %p175_p6 = scmp.lt.s32.totalorder %s653_s16, 1  ;;  %v597_v0 = vmov 6   ;;  %v598_v1 = vmov 0   ;;  %v180_v2 = vld [vmem:[#allocation2] sm:$0xff]  ;;  %v599_v4 = vmov 3   ;;  %s600_s25 = smov 1   ;;  %v193_v15 = vlaneseq }
  0x34   : > { %575 = vsyncadd (%p791_p0), [#allocation3], 4294967168  ;;  %488 = vset.pattern.permute.xlu1 %v597_v0  ;;  %486 = vset.pattern.permute.xlu0 %v598_v1  ;;  %v601_v5 = vmov 9   ;;  %v602_v6 = vmov 1   ;;  %v603_v7 = vmov 4   ;;  %v604_v8 = vmov 10  }
  0x35   : > { %s176_s11 = scalar_select %p175_p6, %s653_s16, 1  ;;  %210 = vperm.xlu1 %488, %v180_v2   ;;  %190 = vperm.xlu0 %486, %v180_v2   ;;  %v605_v9 = vmov 7   ;;  %v607_v10 = vmov 11   ;;  %v608_v11 = vmov 2   ;;  %v609_v12 = vmov 5   ;;  %v181_v14 = vld [vmem:[%s780_s2] sm:$0xff] }
  0x36   : > { %s606_s26 = smov 127   ;;  %v610_v13 = vmov 8   ;;  %v194_v16 = vshrl.u32 %v193_v15, 7  ;;  %vm186_vm0 = vcmask 7168   ;;  %vm272_vm1 = vcmask 121856   ;;  %s172_s29 = sand.u32 1, %s586_s13  }
  0x37   : > { %s417_s17 = sshll.u32 %s176_s11, 2  ;;  %s416_s30 = sshll.u32 %s172_s29, 3  ;;  %vm323_vm3 = vcmask 130048  }
  0x38   : > { %s178_s24 = scalar_lea.vmem %s778_s0, %s417_s17  ;;  %v195_v19 = vsub.s32 0, %v194_v16  ;;  %v215_v20 = vsub.s32 2, %v194_v16  ;;  %v205_v21 = vsub.s32 1, %v194_v16  ;;  %v225_v23 = vsub.s32 3, %v194_v16  ;;  %s419_s4 = sshll.u32 %s653_s16, 7 }
  0x39   : > { %v720_v3 = vld [vmem:[%s178_s24] sm:$0xf]  ;;  %487 = vset.pattern.permute.xlu0 %v599_v4  ;;  %489 = vset.pattern.permute.xlu1 %v601_v5  ;;  %s174_s5 = scalar_lea.vmem [#allocation5], %s416_s30  ;;  %s736_s9 = scalar_lea.hbm %s781_s3, %s419_s4 }
  0x3a   : > { %183 = vrot.lane.b32.xlu1 %v720_v3, %s600_s25  ;;  %200 = vperm.xlu0 %487, %v180_v2   ;;  %v236_v33 = vrot.slane %v720_v3, %v195_v19  ;;  %v246_v42 = vrot.slane %v720_v3, %v205_v21  ;;  %v256_v45 = vrot.slane %v720_v3, %v215_v20  ;;  %s339_s6 = sshll.u32 %s174_s5, 4  ;;  %s326_s10 = scalar_lea.sflag [#allocation4], %s172_s29  ;;  %s738_s6 = int_to_ptr.vmem [resolvable:$true] %s339_s6 }
  0x3b   : > { %v266_v50 = vrot.slane %v720_v3, %v225_v23  ;;  %s528_s11 = scalar_lea.vmem %s738_s6, 128  ;;  %p792_p9 = scmp.ne.s32.totalorder %s785_s22, 0 }
  0x3c   : > { %p529_p5 = scmp.ne.s32.totalorder %s738_s6, %s528_s11  ;;  %s611_s16 = smov [#allocation5]  }
  0x3d   : > { %s532_s17 = sshll.u32 %s611_s16, 4  ;;  %s533_s17 = int_to_ptr.vmem [resolvable:$false] %s532_s17 }
  0x3e   : > { %220 = vperm.xlu1 %489, %v180_v2   ;;  %490 = vset.pattern.permute.xlu0 %v602_v6  ;;  %p530_p10 = pnand %p529_p5, %p792_p9  ;;  %s534_s19 = scalar_lea.vmem %s533_s17, 256 }
  0x3f   : > { %230 = vperm.xlu0 %490, %v180_v2   ;;  %p535_p2 = scmp.lt.s32.totalorder %s738_s6, %s533_s17  ;;  %p536_p3 = scmp.lt.s32.totalorder %s534_s19, %s528_s11 }
  0x40   : > { %p531_p12 = pneg %p530_p10 }
  0x41   : > { %p537_p4 = por %p536_p3, %p535_p2 }
  0x42   : > { %491 = vset.pattern.permute.xlu1 %v603_v7 }
  0x43   : > { %240 = vperm.xlu1 %491, %v180_v2   ;;  %493 = vset.pattern.permute.xlu0 %v604_v8  ;;  %p538_p7 = pnand %p537_p4, %p531_p12 }
  0x44   : > { %260 = vperm.xlu0 %493, %v180_v2  }
  0x47   : > { %492 = vset.pattern.permute.xlu1 %v605_v9 }
  0x48   : > { %250 = vperm.xlu1 %492, %v180_v2   ;;  %269 = vrot.lane.b32.xlu0 %v720_v3, %s606_s26 }
  0x49   : > { %497 = vset.pattern.permute.xlu0 %v607_v10 }
  0x4c   : > { %494 = vset.pattern.permute.xlu1 %v608_v11  ;;  %305 = vperm.xlu0 %497, %v180_v2  }
  0x4d   : > { %275 = vperm.xlu1 %494, %v180_v2  }
  0x50   : > { %499 = vset.pattern.permute.xlu0 %v598_v1 }
  0x51   : > { %495 = vset.pattern.permute.xlu1 %v609_v12 }
  0x52   : > { %285 = vperm.xlu1 %495, %v180_v2  }
  0x56   : > { %496 = vset.pattern.permute.xlu1 %v610_v13 }
  0x57   : > { %295 = vperm.xlu1 %496, %v180_v2  }
  0x5b   : > { %498 = vset.pattern.permute.xlu1 %v598_v1 }
  0x5c   : > { %316 = vperm.xlu1 %498, %v181_v14  }
  0xb4   : > { %v211_v17 = vpop.permute.xlu1 %210  ;;  %v191_v18 = vpop.permute.xlu0 %190 }
  0xb8   : > { %v184_v22 = vpop.permute.xlu1 %183 }
  0xb9   : > { %v187_v24 = vsel %vm186_vm0, 0.0, %v184_v22  ;;  %v201_v25 = vpop.permute.xlu0 %200 }
  0xba   : > { %v196_v26 = vrot.slane %v187_v24, %v195_v19  ;;  %v216_v27 = vrot.slane %v187_v24, %v215_v20  ;;  %v206_v28 = vrot.slane %v187_v24, %v205_v21  ;;  %v226_v31 = vrot.slane %v187_v24, %v225_v23 }
  0xbc   : > { %v197_v29 = vmul.f32 %v196_v26, %v191_v18  ;;  %v207_v30 = vmul.f32 %v206_v28, %v201_v25  ;;  %v217_v35 = vmul.f32 %v216_v27, %v211_v17 }
  0xbd   : > { %v221_v32 = vpop.permute.xlu1 %220 }
  0xbe   : > { %v208_v34 = vadd.f32 %v207_v30, %v197_v29  ;;  %v231_v36 = vpop.permute.xlu0 %230  ;;  %v227_v38 = vmul.f32 %v226_v31, %v221_v32 }
  0xbf   : > { %v237_v39 = vmul.f32 %v236_v33, %v231_v36 }
  0xc0   : > { %v218_v37 = vadd.f32 %v217_v35, %v208_v34 }
  0xc2   : > { %v241_v40 = vpop.permute.xlu1 %240  ;;  %v228_v41 = vadd.f32 %v227_v38, %v218_v37 }
  0xc3   : > { %v261_v43 = vpop.permute.xlu0 %260  ;;  %v247_v46 = vmul.f32 %v246_v42, %v241_v40 }
  0xc4   : > { %v238_v44 = vadd.f32 %v237_v39, %v228_v41  ;;  %v267_v54 = vmul.f32 %v266_v50, %v261_v43 }
  0xc6   : > { %v248_v49 = vadd.f32 %v247_v46, %v238_v44 }
  0xc7   : > { %v251_v47 = vpop.permute.xlu1 %250  ;;  %v270_v48 = vpop.permute.xlu0 %269 }
  0xc8   : > { %v257_v51 = vmul.f32 %v256_v45, %v251_v47  ;;  %v273_v52 = vsel %vm272_vm1, %v270_v48, 0.0 }
  0xc9   : > { %v281_v56 = vrot.slane %v273_v52, %v195_v19  ;;  %v291_v59 = vrot.slane %v273_v52, %v205_v21  ;;  %v311_v62 = vrot.slane %v273_v52, %v225_v23  ;;  %v301_v0 = vrot.slane %v273_v52, %v215_v20 }
  0xca   : > { %v258_v55 = vadd.f32 %v257_v51, %v248_v49 }
  0xcb   : > { %v306_v1 = vpop.permute.xlu0 %305 }
  0xcc   : > { %v276_v53 = vpop.permute.xlu1 %275  ;;  %v268_v57 = vadd.f32 %v267_v54, %v258_v55  ;;  %v312_v5 = vmul.f32 %v311_v62, %v306_v1 }
  0xcd   : > { %v282_v58 = vmul.f32 %v281_v56, %v276_v53 }
  0xcf   : > { %v283_v63 = vadd.f32 %v282_v58, %v268_v57 }
  0xd1   : > { %v286_v60 = vpop.permute.xlu1 %285 }
  0xd2   : > { %v292_v61 = vmul.f32 %v291_v59, %v286_v60 }
  0xd4   : > { %v293_v4 = vadd.f32 %v292_v61, %v283_v63 }
  0xd6   : > { %v296_v2 = vpop.permute.xlu1 %295 }
  0xd7   : > { %v302_v3 = vmul.f32 %v301_v0, %v296_v2 }
  0xd9   : > { %v303_v6 = vadd.f32 %v302_v3, %v293_v4 }
  0xdb   : > { %v317_v7 = vpop.permute.xlu1 %316  ;;  %v313_v8 = vadd.f32 %v312_v5, %v303_v6 }
  0xdd   : > { %v319_v9 = vadd.f32 %v317_v7, %v313_v8 }
  0xdf   : > { %vm320_vm2 = vcmp.ge.f32.partialorder %v319_v9, 0.0  ;;  %v321_v10 = vmul.f32 0.01, %v319_v9 }
  0xe1   : > { %v322_v11 = vsel %vm320_vm2, %v319_v9, %v321_v10 }
  0xe2   : > { %324 = vst.msk [vmem:[%s174_s5] sm:$0xff] %vm323_vm3, %v322_v11 }
  0xe3   : > { %541 = shalt.err (!%p538_p7)
}
  0xe4   : > { %s542_s20 = scalar_lea.hbm %s736_s9, 128  ;;  %s546_s26 = scalar_lea.hbm %s781_s3, 256 }
  0xe5   : > { %p543_p8 = scmp.ne.s32.totalorder %s736_s9, %s542_s20  ;;  %p547_p1 = scmp.lt.u32.totalorder %s736_s9, %s781_s3 }
  0xe6   : > { %p548_p0 = scmp.lt.u32.totalorder %s546_s26, %s542_s20  ;;  %p550_p5 = scmp.lt.u32.totalorder %s542_s20, %s736_s9 }
  0xe7   : > { %p544_p11 = pnand %p543_p8, %p792_p9 }
  0xe8   : > { %p549_p6 = por %p548_p0, %p547_p1 }
  0xe9   : > { %p545_p13 = pneg %p544_p11 }
  0xea   : > { %p551_p10 = por %p550_p5, %p549_p6 }
  0xec   : > { %p552_p12 = pnand %p551_p10, %p545_p13 }
  0xee   : > { %555 = shalt.err (!%p552_p12)
}
  0xef   : > { %426 = dma.vmem_to_hbm [thread:$0]  (%p792_p9), %s738_s6, 128, %s736_s9, %s326_s10  }
  0xf0 PF: > { %p438_p2 = scmp.ge.s32.totalorder %s594_s15, 2  ;;  %s351_s29 = sand.u32 1, %s582_s12  }
  0xf1   : > { %p793_p3 = scmp.ne.s32.totalorder %s786_s23, 0  ;;  %s352_s30 = scalar_lea.sflag [#allocation4], %s351_s29 }
  0xf3   : > { %p433_p4 = pnand %p438_p2, %p793_p3 }
  0xf5   : > { %577 = dma.done.wait (!%p433_p4), %s352_s30, 128  }
  0xf6   : > { %579 = vsyncadd (!%p433_p4), %s352_s30, 4294967168  ;;  %p14_p7 = scmp.ge.s32.totalorder %s657_s18, 4   ;;  %s794_s12 = smov %s586_s13 }
  0xf7   : > { %s795_s13 = smov %s590_s14  ;;  %s796_s14 = smov %s668_s21 }
  0xf8   : > { %s797_s15 = smov %s657_s18  ;;  %16 = sbr.rel (!%p14_p7) target bundleno = 4 (0x4), region = 72 }
  0xff   :  { %357 = vsyncpa [#allocation3], 1 }
 0x100   :  { %359 = vsyncpa [#allocation3 + $0x1], 1 }
 0x101   :  { %360 = vsyncpa [#allocation4], 1 }
 0x102   :  { %362 = vsyncpa [#allocation4 + $0x1], 1 }

</bundles_post_ra>
